<compile_context>
chip_gen: v6e
topology: v6e:2x2x1
jax: 0.10.0
libtpu: 0.0.40
codegen_flags: <defaults>
</compile_context>

<pallas_src>
import jax
import jax.numpy as jnp
from jax.experimental import pallas as pl
from jax.experimental.pallas import tpu as pltpu


def _round_up(n, m):
    return ((n + m - 1) // m) * m


def mlp_kernel(x_ref, w1_ref, b1_ref, w2_ref, b2_ref, o_ref):
    # Linear1 (MXU, f32 accumulate) + bias, ReLU (VPU), Linear2 (MXU) + bias.
    x = x_ref[...]
    h = jnp.maximum(
        jnp.dot(x, w1_ref[...], preferred_element_type=jnp.float32) + b1_ref[...],
        0.0,
    )
    o_ref[...] = (
        jnp.dot(h, w2_ref[...], preferred_element_type=jnp.float32) + b2_ref[...]
    ).astype(o_ref.dtype)


def pad_params(w1, b1, w2, b2, dtype=jnp.float32):
    """One-time padding of the hidden dim to a lane-dense multiple of 128.

    Call once at init and reuse the result for every forward call (hoists the
    pad kernels and HBM weight rewrites out of the hot path).  Zero padding is
    exact: padded hidden columns get bias 0 -> ReLU(0) = 0 -> hit zero rows of
    w2, contributing nothing to the output.
    """
    H = w1.shape[1]
    H_p = _round_up(H, 128)
    w1p = jnp.pad(w1, ((0, 0), (0, H_p - H))).astype(dtype)
    b1p = jnp.pad(b1, ((0, 0), (0, H_p - H))).astype(jnp.float32)
    w2p = jnp.pad(w2, ((0, H_p - H), (0, 0))).astype(dtype)
    b2p = b2.astype(jnp.float32)
    return w1p, b1p, w2p, b2p


def _lane_padded_bytes(rows, cols, itemsize):
    """VMEM footprint of a (rows, cols) operand in (8,128)-tiled layout."""
    return _round_up(max(rows, 1), 8) * _round_up(max(cols, 1), 128) * itemsize


def mlp_forward(x, w1p, b1p, w2p, b2p, *, tile_m=1024):
    """x: (B, D_in); w1p: (D_in, H_p); b1p: (1, H_p); w2p: (H_p, D_out);
    b2p: (1, D_out) -> (B, D_out) f32.  Weights must be pre-padded via
    pad_params (hidden dim a multiple of 128)."""
    B, D_in = x.shape
    H_p = w1p.shape[1]
    D_out = w2p.shape[1]
    itemsize = 4  # f32 activations/output

    # --- tiling over the batch dim ------------------------------------------
    grid_m = pl.cdiv(B, tile_m)
    if grid_m > 1 and grid_m % 2 == 1:
        # Even split so v7x's two TensorCores both get work on the "parallel"
        # batch axis; costs one extra ~0.35us step on single-TC chips.
        grid_m += 1
    TM = _round_up(pl.cdiv(B, grid_m), 8)
    grid_m = pl.cdiv(B, TM)  # partial final tile; Pallas masks edge writes

    flops = 2 * B * (D_in * H_p + H_p * D_out)
    param_bytes = (
        w1p.size * w1p.dtype.itemsize + b1p.size * 4 + w2p.size * w2p.dtype.itemsize + b2p.size * 4
    )
    act_bytes = B * (D_in + D_out) * itemsize
    cost = pl.CostEstimate(
        flops=flops, transcendentals=0, bytes_accessed=act_bytes + param_bytes
    )

    if grid_m == 1:
        # Grid-less fast path: whole (small) problem resident in VMEM, no
        # pipeline machinery, no per-step overhead, unpadded in/out arrays.
        return pl.pallas_call(
            mlp_kernel,
            out_shape=jax.ShapeDtypeStruct((B, D_out), jnp.float32),
            in_specs=[pl.BlockSpec(memory_space=pltpu.MemorySpace.VMEM)] * 5,
            out_specs=pl.BlockSpec(memory_space=pltpu.MemorySpace.VMEM),
            cost_estimate=cost,
        )(x, w1p, b1p, w2p, b2p)

    # Batch-tiled path: weights/biases resident (constant index_map, one DMA
    # total), activation tiles streamed.  x / out keep their true feature
    # widths (== full array dims) so only useful bytes move through HBM.
    resident = (
        _lane_padded_bytes(D_in, H_p, w1p.dtype.itemsize)
        + _lane_padded_bytes(1, H_p, 4)
        + _lane_padded_bytes(H_p, D_out, w2p.dtype.itemsize)
        + _lane_padded_bytes(1, D_out, 4)
    )
    streamed = 2 * (  # double-buffered activation tiles
        _lane_padded_bytes(TM, D_in, itemsize) + _lane_padded_bytes(TM, D_out, itemsize)
    )
    budget = 2 * resident + streamed  # resident operands also get 2 buffers by default
    vmem_limit = int(min(128 * 2**20, max(16 * 2**20, 2 * budget)))

    return pl.pallas_call(
        mlp_kernel,
        out_shape=jax.ShapeDtypeStruct((B, D_out), jnp.float32),
        grid=(grid_m,),
        in_specs=[
            pl.BlockSpec((TM, D_in), lambda i: (i, 0)),
            pl.BlockSpec((D_in, H_p), lambda i: (0, 0)),
            pl.BlockSpec((1, H_p), lambda i: (0, 0)),
            pl.BlockSpec((H_p, D_out), lambda i: (0, 0)),
            pl.BlockSpec((1, D_out), lambda i: (0, 0)),
        ],
        out_specs=pl.BlockSpec((TM, D_out), lambda i: (i, 0)),
        compiler_params=pltpu.CompilerParams(
            dimension_semantics=("parallel",),
            vmem_limit_bytes=vmem_limit,
        ),
        cost_estimate=cost,
    )(x, w1p, b1p, w2p, b2p)


def init_params(key, input_dim, hidden_dim, output_dim):
    """Deterministic init mimicking PyTorch nn.Linear (uniform +-1/sqrt(fan_in))."""
    k1, k2, k3, k4 = jax.random.split(key, 4)
    bound1 = 1.0 / jnp.sqrt(input_dim)
    bound2 = 1.0 / jnp.sqrt(hidden_dim)
    # Stored as (in_features, out_features) -- transpose of PyTorch's weight.
    w1 = jax.random.uniform(k1, (input_dim, hidden_dim), jnp.float32, -bound1, bound1)
    b1 = jax.random.uniform(k2, (1, hidden_dim), jnp.float32, -bound1, bound1)
    w2 = jax.random.uniform(k3, (hidden_dim, output_dim), jnp.float32, -bound2, bound2)
    b2 = jax.random.uniform(k4, (1, output_dim), jnp.float32, -bound2, bound2)
    return w1, b1, w2, b2


def _reference(x, w1, b1, w2, b2):
    return jnp.maximum(x @ w1 + b1, 0.0) @ w2 + b2


if __name__ == "__main__":
    # Shapes consistent with MLP(input_dim, output_dim): hidden fixed at 100.
    input_dim, hidden_dim, output_dim = 32, 100, 10

    key = jax.random.PRNGKey(0)
    kx1, kx2, kp = jax.random.split(key, 3)
    w1, b1, w2, b2 = init_params(kp, input_dim, hidden_dim, output_dim)
    # Padding is done ONCE here, at init -- not inside the per-call forward.
    w1p, b1p, w2p, b2p = pad_params(w1, b1, w2, b2)

    # Small batch: exercises the grid-less, everything-resident-in-VMEM path.
    x_small = jax.random.normal(kx1, (8, input_dim), jnp.float32)
    out_small = jax.block_until_ready(mlp_forward(x_small, w1p, b1p, w2p, b2p))
    ref_small = _reference(x_small, w1, b1, w2, b2)
    assert out_small.shape == (8, output_dim)
    assert jnp.allclose(out_small, ref_small, atol=1e-5, rtol=1e-5)

    # Non-tile-aligned batch with a small tile override: exercises the
    # batch-tiled path (resident weights, partial final tile, even grid).
    x_big = jax.random.normal(kx2, (300, input_dim), jnp.float32)
    out_big = jax.block_until_ready(
        mlp_forward(x_big, w1p, b1p, w2p, b2p, tile_m=128)
    )
    ref_big = _reference(x_big, w1, b1, w2, b2)
    assert out_big.shape == (300, output_dim)
    assert jnp.allclose(out_big, ref_big, atol=1e-5, rtol=1e-5)

    print("KERNEL_OK")
</pallas_src>

<mosaic_0001>
module attributes {stable_mosaic.version = 11 : i64} {
  func.func @mlp_kernel(%arg0: memref<8x32xf32, #tpu.memory_space<vmem>>, %arg1: memref<32x128xf32, #tpu.memory_space<vmem>>, %arg2: memref<1x128xf32, #tpu.memory_space<vmem>>, %arg3: memref<128x10xf32, #tpu.memory_space<vmem>>, %arg4: memref<1x10xf32, #tpu.memory_space<vmem>>, %arg5: memref<8x10xf32, #tpu.memory_space<vmem>>) attributes {dimension_semantics = [], scalar_prefetch = 0 : i64, scratch_operands = 0 : i64, tpu.core_type = #tpu.core_type<tc>} {
    %c0 = arith.constant 0 : index
    %c0_0 = arith.constant 0 : index
    %0 = vector.load %arg0[%c0, %c0_0] : memref<8x32xf32, #tpu.memory_space<vmem>>, vector<8x32xf32>
    %c0_1 = arith.constant 0 : index
    %c0_2 = arith.constant 0 : index
    %1 = vector.load %arg1[%c0_1, %c0_2] : memref<32x128xf32, #tpu.memory_space<vmem>>, vector<32x128xf32>
    %cst = arith.constant dense<0.000000e+00> : vector<8x128xf32>
    %2 = tpu.matmul %0, %1, %cst {dimension_numbers = #tpu.dot_dimension_numbers<[1], [0], [0], [1], [0, 0, 1, 1], [], []>} : vector<8x32xf32>, vector<32x128xf32>, vector<8x128xf32> -> vector<8x128xf32>
    %c0_3 = arith.constant 0 : index
    %c0_4 = arith.constant 0 : index
    %3 = vector.load %arg2[%c0_3, %c0_4] : memref<1x128xf32, #tpu.memory_space<vmem>>, vector<1x128xf32>
    %4 = vector.broadcast %3 : vector<1x128xf32> to vector<8x128xf32>
    %5 = arith.addf %2, %4 : vector<8x128xf32>
    %cst_5 = arith.constant 0.000000e+00 : f32
    %6 = vector.broadcast %cst_5 : f32 to vector<8x128xf32>
    %7 = arith.maximumf %5, %6 : vector<8x128xf32>
    %c0_6 = arith.constant 0 : index
    %c0_7 = arith.constant 0 : index
    %8 = vector.load %arg3[%c0_6, %c0_7] : memref<128x10xf32, #tpu.memory_space<vmem>>, vector<128x10xf32>
    %cst_8 = arith.constant dense<0.000000e+00> : vector<8x10xf32>
    %9 = tpu.matmul %7, %8, %cst_8 {dimension_numbers = #tpu.dot_dimension_numbers<[1], [0], [0], [1], [0, 0, 1, 1], [], []>} : vector<8x128xf32>, vector<128x10xf32>, vector<8x10xf32> -> vector<8x10xf32>
    %c0_9 = arith.constant 0 : index
    %c0_10 = arith.constant 0 : index
    %10 = vector.load %arg4[%c0_9, %c0_10] : memref<1x10xf32, #tpu.memory_space<vmem>>, vector<1x10xf32>
    %11 = vector.broadcast %10 : vector<1x10xf32> to vector<8x10xf32>
    %12 = arith.addf %9, %11 : vector<8x10xf32>
    %c0_11 = arith.constant 0 : index
    %c0_12 = arith.constant 0 : index
    %13 = vector.load %arg5[%c0_11, %c0_12] : memref<8x10xf32, #tpu.memory_space<vmem>>, vector<8x10xf32>
    tpu.vector_store %arg5[%c0_11, %c0_12], %12 {strides = array<i32>} : memref<8x10xf32, #tpu.memory_space<vmem>>, vector<8x10xf32>,
    return
  }
}

</mosaic_0001>

<bundles_post_ra>
// kernel: tpu_custom_call.1
= control target key start
LH: loop header
LB: loop body
LE: loop exit
PB: predicated region body
PF: predicated region fallthrough
CT: control target
= control target key end

     0   :  { %v313_v1 = vmov 0.0   ;;  %vm314_vm0 = vmmov 0   ;;  %vm33_vm1 = vcmask 261120   ;;  %s442_s0 = inlined_call_operand.vmem [shape: f32[8,32], index: 0, kind: input, shape index: {}]   ;;  %s443_s1 = inlined_call_operand.vmem [shape: f32[32,128], index: 1, kind: input, shape index: {}]   ;;  %s444_s2 = inlined_call_operand.vmem [shape: f32[1,128], index: 2, kind: input, shape index: {}]   ;;  %s445_s3 = inlined_call_operand.vmem [shape: f32[128,10], index: 3, kind: input, shape index: {}]   ;;  %s446_s4 = inlined_call_operand.vmem [shape: f32[1,10], index: 4, kind: input, shape index: {}]   ;;  %s447_s5 = inlined_call_operand.hbm [shape: f32[8,10], index: 5, kind: output, shape index: {}]  }
   0x1   :  { %v25_v0 = vld [vmem:[%s443_s1 + $0x18] sm:$0xff]  ;;  %242 = vmatprep.subr.mxu0 %v313_v1  ;;  %v24_v2 = vld [vmem:[%s443_s1 + $0x10] sm:$0xff]  ;;  %250 = vmatprep.mubr.msk.f32.mxu0 %vm314_vm0, %v313_v1  ;;  %v23_v5 = vld [vmem:[%s443_s1 + $0x8] sm:$0xff] }
   0x2   :  { %v123_v3 = vld [vmem:[%s445_s3 + $0x78] sm:$0xff]  ;;  %243 = vmatpush3.msra.mxu0 %v25_v0  ;;  %253 = vmatprep.subr.mxu1 %v313_v1  ;;  %v122_v4 = vld [vmem:[%s445_s3 + $0x70] sm:$0xff]  ;;  %v121_v6 = vld [vmem:[%s445_s3 + $0x68] sm:$0xff] }
   0x3   :  { %244 = vmatprep.subr.mxu0 %v313_v1  ;;  %254 = vmatpush3.msra.mxu1 %v123_v3  ;;  %v22_v7 = vld [vmem:[%s443_s1] sm:$0xff] }
   0x4   :  { %245 = vmatpush3.msra.mxu0 %v24_v2  ;;  %255 = vmatprep.subr.mxu1 %v313_v1  ;;  %v21_v8 = vld [vmem:[%s442_s0] sm:$0xff] }
   0x5   :  { %246 = vmatprep.subr.mxu0 %v313_v1  ;;  %256 = vmatpush3.msra.mxu1 %v122_v4  ;;  %v120_v9 = vld [vmem:[%s445_s3 + $0x60] sm:$0xff] }
   0x6   :  { %247 = vmatpush3.msra.mxu0 %v23_v5  ;;  %257 = vmatprep.subr.mxu1 %v313_v1 }
   0x7   :  { %10 = vsyncpa [#allocation3], 0  ;;  %248 = vmatprep.subr.mxu0 %v313_v1  ;;  %258 = vmatpush3.msra.mxu1 %v121_v6  ;;  %v119_v10 = vld [vmem:[%s445_s3 + $0x58] sm:$0xff]  ;;  %v118_v11 = vld [vmem:[%s445_s3 + $0x50] sm:$0xff]  ;;  %s315_s11 = smov [#allocation2]   ;;  %vm201_vm2 = vcmask 80896  }
   0x8   :  { %249 = vmatpush3.msra.mxu0 %v22_v7  ;;  %259 = vmatprep.subr.mxu1 %v313_v1  ;;  %v117_v12 = vld [vmem:[%s445_s3 + $0x48] sm:$0xff]  ;;  %v116_v13 = vld [vmem:[%s445_s3 + $0x40] sm:$0xff]  ;;  %v115_v14 = vld [vmem:[%s445_s3 + $0x38] sm:$0xff]  ;;  %s209_s0 = sshll.u32 %s315_s11, 4  ;;  %s210_s0 = int_to_ptr.vmem [resolvable:$true] %s209_s0 }
   0x9   :  { %251 = vmatmul.mubr.msk.f32.vlgmr.msra.gmra.mxu0 %vm33_vm1, %v21_v8  ;;  %260 = vmatpush3.msra.mxu1 %v120_v9  ;;  %v114_v15 = vld [vmem:[%s445_s3 + $0x30] sm:$0xff]  ;;  %v113_v16 = vld [vmem:[%s445_s3 + $0x28] sm:$0xff]  ;;  %v112_v17 = vld [vmem:[%s445_s3 + $0x20] sm:$0xff]  ;;  %p296_p1 = scmp.lt.s32.totalorder %s210_s0, %s210_s0 }
   0xa   :  { %261 = vmatprep.subr.mxu1 %v313_v1  ;;  %285 = vmatprep.mubr.msk.f32.mxu1 %vm314_vm0, %v313_v1  ;;  %v111_v18 = vld [vmem:[%s445_s3 + $0x18] sm:$0xff]  ;;  %v110_v19 = vld [vmem:[%s445_s3 + $0x10] sm:$0xff]  ;;  %v109_v20 = vld [vmem:[%s445_s3 + $0x8] sm:$0xff] }
   0xb   :  { %262 = vmatpush3.msra.mxu1 %v119_v10  ;;  %v108_v21 = vld [vmem:[%s445_s3] sm:$0xff]  ;;  %s291_s3 = scalar_lea.vmem %s210_s0, 128 }
   0xc   :  { %263 = vmatprep.subr.mxu1 %v313_v1  ;;  %v217_v22 = vld [vmem:[%s444_s2] ss:$0 sm:$0xff]  ;;  %p292_p0 = scmp.ne.s32.totalorder %s210_s0, %s291_s3  ;;  %p297_p2 = scmp.lt.s32.totalorder %s291_s3, %s291_s3 }
   0xd   :  { %264 = vmatpush3.msra.mxu1 %v118_v11  ;;  %v219_v27 = vld [vmem:[%s446_s4] ss:$0 sm:$0xff] }
   0xe   :  { %265 = vmatprep.subr.mxu1 %v313_v1  ;;  %p298_p3 = por %p297_p2, %p296_p1 }
   0xf   :  { %266 = vmatpush3.msra.mxu1 %v117_v12 }
  0x10   :  { %267 = vmatprep.subr.mxu1 %v313_v1  ;;  %p299_p4 = pnand %p298_p3, %p292_p0 }
  0x11   :  { %268 = vmatpush3.msra.mxu1 %v116_v13 }
  0x12   :  { %269 = vmatprep.subr.mxu1 %v313_v1 }
  0x13   :  { %270 = vmatpush3.msra.mxu1 %v115_v14 }
  0x14   :  { %271 = vmatprep.subr.mxu1 %v313_v1 }
  0x15   :  { %272 = vmatpush3.msra.mxu1 %v114_v15 }
  0x16   :  { %273 = vmatprep.subr.mxu1 %v313_v1 }
  0x17   :  { %274 = vmatpush3.msra.mxu1 %v113_v16 }
  0x18   :  { %275 = vmatprep.subr.mxu1 %v313_v1 }
  0x19   :  { %276 = vmatpush3.msra.mxu1 %v112_v17 }
  0x1a   :  { %277 = vmatprep.subr.mxu1 %v313_v1 }
  0x1b   :  { %278 = vmatpush3.msra.mxu1 %v111_v18 }
  0x1c   :  { %279 = vmatprep.subr.mxu1 %v313_v1 }
  0x1d   :  { %280 = vmatpush3.msra.mxu1 %v110_v19 }
  0x1e   :  { %281 = vmatprep.subr.mxu1 %v313_v1 }
  0x1f   :  { %282 = vmatpush3.msra.mxu1 %v109_v20 }
  0x20   :  { %283 = vmatprep.subr.mxu1 %v313_v1 }
  0x21   :  { %284 = vmatpush3.msra.mxu1 %v108_v21 }
  0xc9   :  { %v103_v23 = vpop.f32.mrf.mxu0 }
  0xca   :  { %v104_v24 = vadd.f32 %v217_v22, %v103_v23 }
  0xcb   :  { %v252_v25 = vpop.f32.mrf.mxu0 }
  0xcc   :  { %v107_v26 = vmax.f32 %v104_v24, 0.0 }
  0xce   :  { %286 = vmatmul.mubr.f32.vlgmr.msra.gmra.mxu1 %v107_v26 }
 0x18e   :  { %v197_v28 = vpop.f32.mrf.mxu1 }
 0x18f   :  { %v198_v29 = vadd.f32 %v219_v27, %v197_v28 }
 0x190   :  { %v287_v30 = vpop.f32.mrf.mxu1 }
 0x191   :  { %202 = vst.msk [vmem:[#allocation2] sm:$0xff] %vm201_vm2, %v198_v29 }
 0x192   :  { %302 = shalt.err (!%p299_p4)
}
 0x193   :  { %212 = dma.vmem_to_hbm [thread:$0]  %s210_s0, 128, %s447_s5, [#allocation3]  }
 0x194   :  { %311 = dma.done.wait [#allocation3], 128  }
 0x195   :  { %312 = vsyncadd [#allocation3], 4294967168 }
 0x196   :  { %216 = vsyncpa [#allocation3], 1 }

</bundles_post_ra>
